<compile_context>
chip_gen: v6e
topology: v6e:2x2x1
jax: 0.10.0
libtpu: 0.0.40
codegen_flags: <defaults>
</compile_context>

<pallas_src>
import functools

import jax
import jax.numpy as jnp
from jax.experimental import pallas as pl
from jax.experimental.pallas import tpu as pltpu


def _rup(x, m):
    return (x + m - 1) // m * m


def _pad_to(x, shape):
    return jnp.pad(x, [(0, s - d) for d, s in zip(x.shape, shape)])


# ---------------------------------------------------------------------------
# Kernel 1: time-parallel x-side projections (hoisted out of the recurrence).
#   gx = x @ Wx + bx   (all 3 gates),  rx = x @ Wr_x
# ---------------------------------------------------------------------------
def xproj_kernel(x_ref, wx_ref, bx_ref, wrx_ref, gx_ref, rx_ref):
    x = x_ref[...]                                                   # (RB, E) bf16
    gx_ref[...] = (jnp.dot(x, wx_ref[...], preferred_element_type=jnp.float32)
                   + bx_ref[...])
    rx_ref[...] = jnp.dot(x, wrx_ref[...], preferred_element_type=jnp.float32)


# ---------------------------------------------------------------------------
# Kernel 2: per-time-step GRU + attention + readout (sequential grid over T).
# The carried hidden state lives in the constant-index output block `h_ref`.
# ---------------------------------------------------------------------------
def decoder_step_kernel(gx_ref, rx_ref, sb_ref, h0_ref,
                        wh_ref, bh_ref, wa_ref, wrh_ref, wrc_ref, br_ref,
                        out_ref, h_ref, *, s_valid):
    t = pl.program_id(0)
    Hp = h0_ref.shape[-1]

    @pl.when(t == 0)
    def _():
        h_ref[...] = h0_ref[...]

    h = h_ref[...]                                                   # (B, H) f32
    gx = gx_ref[0]                                                   # (B, 3H) f32

    # --- GRU cell (x-side precomputed; only h-side matmul on the serial path)
    gh = jnp.dot(h.astype(jnp.bfloat16), wh_ref[...],
                 preferred_element_type=jnp.float32) + bh_ref[...]   # (B, 3H)
    r = jax.nn.sigmoid(gx[:, 0 * Hp:1 * Hp] + gh[:, 0 * Hp:1 * Hp])
    z = jax.nn.sigmoid(gx[:, 1 * Hp:2 * Hp] + gh[:, 1 * Hp:2 * Hp])
    n = jnp.tanh(gx[:, 2 * Hp:3 * Hp] + r * gh[:, 2 * Hp:3 * Hp])
    h_new = (1.0 - z) * n + z * h                                    # (B, H)

    # --- dot-product attention over (lane-dense, padded) encoder states
    sb = sb_ref[...]                                                 # (B, S, H) bf16
    ha = jnp.dot(h_new.astype(jnp.bfloat16), wa_ref[...],
                 preferred_element_type=jnp.float32)                 # (B, H)
    scores = jnp.einsum('bh,bsh->bs', ha.astype(jnp.bfloat16), sb,
                        preferred_element_type=jnp.float32)          # (B, S)
    col = jax.lax.broadcasted_iota(jnp.int32, scores.shape, 1)
    scores = jnp.where(col < s_valid, scores, -1e30)                 # mask S padding
    m = jnp.max(scores, axis=-1, keepdims=True)
    e = jnp.exp(scores - m)
    alpha = e * pl.reciprocal(jnp.sum(e, axis=-1, keepdims=True), approx=True)
    ctx = jnp.einsum('bs,bsh->bh', alpha.astype(jnp.bfloat16), sb,
                     preferred_element_type=jnp.float32)             # (B, H)

    # --- readout: Wr split per input (no concat; x-part precomputed in rx)
    readout = jnp.tanh(
        jnp.dot(h_new.astype(jnp.bfloat16), wrh_ref[...],
                preferred_element_type=jnp.float32)
        + jnp.dot(ctx.astype(jnp.bfloat16), wrc_ref[...],
                  preferred_element_type=jnp.float32)
        + rx_ref[0] + br_ref[...])

    out_ref[0] = readout
    h_ref[...] = h_new


# ---------------------------------------------------------------------------
# Kernel 3: LVT projection pass 1 — row-blocked logits + online logsumexp
# stats across V blocks.
# ---------------------------------------------------------------------------
def lvt_logits_kernel(r_ref, lvt_ref, logits_ref, m_ref, logz_ref,
                      m_sc, l_sc, *, v_valid, v_block):
    v = pl.program_id(1)

    @pl.when(v == 0)
    def _():
        m_sc[...] = jnp.full_like(m_sc, -1e30)
        l_sc[...] = jnp.zeros_like(l_sc)

    r = r_ref[...].astype(jnp.bfloat16)                              # (RB, H)
    logits = jnp.dot(r, lvt_ref[...],
                     preferred_element_type=jnp.float32)             # (RB, VB)
    col = v * v_block + jax.lax.broadcasted_iota(jnp.int32, logits.shape, 1)
    lm = jnp.where(col < v_valid, logits, -1e30)                     # mask V padding
    m_new = jnp.maximum(m_sc[...], jnp.max(lm, axis=-1, keepdims=True))
    l_sc[...] = (l_sc[...] * jnp.exp(m_sc[...] - m_new)
                 + jnp.sum(jnp.exp(lm - m_new), axis=-1, keepdims=True))
    m_sc[...] = m_new
    logits_ref[...] = logits

    @pl.when(v == pl.num_programs(1) - 1)
    def _():
        m_ref[...] = m_sc[...]
        logz_ref[...] = jnp.log(l_sc[...])


# ---------------------------------------------------------------------------
# Kernel 4: LVT projection pass 2 — log-softmax normalize + length mask.
# ---------------------------------------------------------------------------
def lvt_normalize_kernel(logits_ref, m_ref, logz_ref, mask_ref, out_ref):
    lp = logits_ref[...] - m_ref[...] - logz_ref[...]
    out_ref[...] = jnp.where(mask_ref[...] > 0, lp, 0.0)


# ---------------------------------------------------------------------------
# Wrapper (plain-JAX glue: padding / casts / reshapes around the pallas_calls).
# ---------------------------------------------------------------------------
def generator_flat_forward(LVT, state_below, Inputs, params, hidden_prev=None):
    """Mirrors Generator_Flat.forward(LVT, state_below, Inputs, hidden_prev).

    LVT:         (W_out_full (V_full, H), lvt_idx (V_lvt,)) — LVT vocab subset.
    state_below: (B, S, H) encoder states.
    Inputs:      (target_emb (B, T, E), len_target (B,) int32).
    hidden_prev: (B, H) or None.
    Returns: (log_probs (B, T, V_lvt), h_last (B, H)).
    """
    f32, bf16 = jnp.float32, jnp.bfloat16
    w_out_full, lvt_idx = LVT
    target_emb, len_target = Inputs
    B, T, E = target_emb.shape
    _, S, H = state_below.shape
    V = lvt_idx.shape[0]

    if hidden_prev is None:
        hidden_prev = jnp.zeros((B, H), f32)

    # Padded (8,128)-friendly sizes.
    Bp = max(_rup(B, 8), 8)
    Hp = _rup(H, 128)
    Ep = _rup(E, 128)
    Sp = _rup(S, 128)
    Vp = _rup(V, 128)

    # ---- weights: per-gate padding (so gate slices stay lane-aligned), bf16.
    def pad_gates(w, din, dinp):
        return _pad_to(w.reshape(din, 3, H), (dinp, 3, Hp)).reshape(dinp, 3 * Hp)

    wx = pad_gates(params['Wx'], E, Ep).astype(bf16)
    wh = pad_gates(params['Wh'], H, Hp).astype(bf16)
    bx = _pad_to(params['bx'].reshape(1, 3, H), (1, 3, Hp)).reshape(1, 3 * Hp).astype(f32)
    bh = _pad_to(params['bh'].reshape(1, 3, H), (1, 3, Hp)).reshape(1, 3 * Hp).astype(f32)
    wa = _pad_to(params['Wa'], (Hp, Hp)).astype(bf16)
    wr = params['Wr']
    wr_h = _pad_to(wr[:H], (Hp, Hp)).astype(bf16)
    wr_c = _pad_to(wr[H:2 * H], (Hp, Hp)).astype(bf16)
    wr_x = _pad_to(wr[2 * H:], (Ep, Hp)).astype(bf16)
    br = _pad_to(params['br'], (1, Hp)).astype(f32)

    # LVT gather + transpose to (H, V) (lane-dense), padded, bf16.
    lvt_t = _pad_to(jnp.take(w_out_full, lvt_idx, axis=0).T, (Hp, Vp)).astype(bf16)

    sb = _pad_to(state_below, (Bp, Sp, Hp)).astype(bf16)
    h0 = _pad_to(hidden_prev.astype(f32), (Bp, Hp))

    # ---- time-major flattened embeddings (T*Bp rows) for the batched x-projections.
    x_tbe = _pad_to(jnp.transpose(target_emb, (1, 0, 2)), (T, Bp, Ep))
    rows = T * Bp
    RB = min(256, _rup(rows, 8))
    rows_pad = _rup(rows, RB)
    nrb = rows_pad // RB
    x_flat = _pad_to(x_tbe.reshape(rows, Ep), (rows_pad, Ep)).astype(bf16)

    # ---------------- Kernel A: hoisted x-side matmuls ----------------
    gx_flat, rx_flat = pl.pallas_call(
        xproj_kernel,
        out_shape=(jax.ShapeDtypeStruct((rows_pad, 3 * Hp), f32),
                   jax.ShapeDtypeStruct((rows_pad, Hp), f32)),
        grid_spec=pltpu.PrefetchScalarGridSpec(
            num_scalar_prefetch=0,
            grid=(nrb,),
            in_specs=[
                pl.BlockSpec((RB, Ep), lambda i: (i, 0)),
                pl.BlockSpec((Ep, 3 * Hp), lambda i: (0, 0)),
                pl.BlockSpec((1, 3 * Hp), lambda i: (0, 0)),
                pl.BlockSpec((Ep, Hp), lambda i: (0, 0)),
            ],
            out_specs=[
                pl.BlockSpec((RB, 3 * Hp), lambda i: (i, 0)),
                pl.BlockSpec((RB, Hp), lambda i: (i, 0)),
            ],
        ),
        compiler_params=pltpu.CompilerParams(dimension_semantics=("parallel",)),
    )(x_flat, wx, bx, wr_x)

    gx_t = gx_flat[:rows].reshape(T, Bp, 3 * Hp)
    rx_t = rx_flat[:rows].reshape(T, Bp, Hp)

    # ---------------- Kernel B: sequential recurrence ----------------
    step = functools.partial(decoder_step_kernel, s_valid=S)
    readout_tbh, h_last_pad = pl.pallas_call(
        step,
        out_shape=(jax.ShapeDtypeStruct((T, Bp, Hp), f32),
                   jax.ShapeDtypeStruct((Bp, Hp), f32)),
        grid_spec=pltpu.PrefetchScalarGridSpec(
            num_scalar_prefetch=0,
            grid=(T,),
            in_specs=[
                pl.BlockSpec((1, Bp, 3 * Hp), lambda t: (t, 0, 0)),   # gx per step
                pl.BlockSpec((1, Bp, Hp), lambda t: (t, 0, 0)),       # rx per step
                pl.BlockSpec((Bp, Sp, Hp), lambda t: (0, 0, 0)),      # state_below
                pl.BlockSpec((Bp, Hp), lambda t: (0, 0)),             # hidden_prev
                pl.BlockSpec((Hp, 3 * Hp), lambda t: (0, 0)),         # Wh
                pl.BlockSpec((1, 3 * Hp), lambda t: (0, 0)),          # bh
                pl.BlockSpec((Hp, Hp), lambda t: (0, 0)),             # Wa
                pl.BlockSpec((Hp, Hp), lambda t: (0, 0)),             # Wr_h
                pl.BlockSpec((Hp, Hp), lambda t: (0, 0)),             # Wr_c
                pl.BlockSpec((1, Hp), lambda t: (0, 0)),              # br
            ],
            out_specs=[
                pl.BlockSpec((1, Bp, Hp), lambda t: (t, 0, 0)),       # readout/step
                pl.BlockSpec((Bp, Hp), lambda t: (0, 0)),             # carried hidden
            ],
        ),
        compiler_params=pltpu.CompilerParams(dimension_semantics=("arbitrary",)),
    )(gx_t, rx_t, sb, h0, wh, bh, wa, wr_h, wr_c, br)

    # ---------------- Kernels C/D: LVT projection over T*B rows ----------------
    r_flat = _pad_to(readout_tbh.reshape(rows, Hp), (rows_pad, Hp))

    VB = 512 if Vp % 512 == 0 else (256 if Vp % 256 == 0 else 128)
    nvb = Vp // VB

    # Per-row validity (batch real AND t < len_target[b]); row = t*Bp + b.
    lenb = _pad_to(len_target.astype(jnp.int32), (Bp,))
    tmask = (jnp.arange(T, dtype=jnp.int32)[:, None] < lenb[None, :]).astype(f32)
    rowmask = _pad_to(tmask.reshape(rows, 1), (rows_pad, 1))

    lvt1 = functools.partial(lvt_logits_kernel, v_valid=V, v_block=VB)
    logits_flat, m_flat, logz_flat = pl.pallas_call(
        lvt1,
        out_shape=(jax.ShapeDtypeStruct((rows_pad, Vp), f32),
                   jax.ShapeDtypeStruct((rows_pad, 1), f32),
                   jax.ShapeDtypeStruct((rows_pad, 1), f32)),
        grid_spec=pltpu.PrefetchScalarGridSpec(
            num_scalar_prefetch=0,
            grid=(nrb, nvb),
            in_specs=[
                pl.BlockSpec((RB, Hp), lambda r, v: (r, 0)),
                pl.BlockSpec((Hp, VB), lambda r, v: (0, v)),
            ],
            out_specs=[
                pl.BlockSpec((RB, VB), lambda r, v: (r, v)),
                pl.BlockSpec((RB, 1), lambda r, v: (r, 0)),
                pl.BlockSpec((RB, 1), lambda r, v: (r, 0)),
            ],
            scratch_shapes=[pltpu.VMEM((RB, 1), f32),
                            pltpu.VMEM((RB, 1), f32)],
        ),
        compiler_params=pltpu.CompilerParams(
            dimension_semantics=("parallel", "arbitrary")),
    )(r_flat, lvt_t)

    logprobs_flat = pl.pallas_call(
        lvt_normalize_kernel,
        out_shape=jax.ShapeDtypeStruct((rows_pad, Vp), f32),
        grid_spec=pltpu.PrefetchScalarGridSpec(
            num_scalar_prefetch=0,
            grid=(nrb, nvb),
            in_specs=[
                pl.BlockSpec((RB, VB), lambda r, v: (r, v)),
                pl.BlockSpec((RB, 1), lambda r, v: (r, 0)),
                pl.BlockSpec((RB, 1), lambda r, v: (r, 0)),
                pl.BlockSpec((RB, 1), lambda r, v: (r, 0)),
            ],
            out_specs=pl.BlockSpec((RB, VB), lambda r, v: (r, v)),
        ),
        compiler_params=pltpu.CompilerParams(
            dimension_semantics=("parallel", "parallel")),
    )(logits_flat, m_flat, logz_flat, rowmask)

    lp = logprobs_flat[:rows].reshape(T, Bp, Vp)[:, :B, :V]
    log_probs = jnp.transpose(lp, (1, 0, 2))                         # (B, T, V)
    # Note: h_last is the hidden after step T-1 (GRU keeps updating past
    # len_target), matching the previous implementation's semantics.
    h_last = h_last_pad[:B, :H]
    return log_probs, h_last


def init_params(key, E, H, V_full):
    ks = jax.random.split(key, 8)
    s = 0.1
    return {
        'Wx': s * jax.random.normal(ks[0], (E, 3 * H), jnp.float32),
        'Wh': s * jax.random.normal(ks[1], (H, 3 * H), jnp.float32),
        'bx': jnp.zeros((1, 3 * H), jnp.float32),
        'bh': jnp.zeros((1, 3 * H), jnp.float32),
        'Wa': s * jax.random.normal(ks[2], (H, H), jnp.float32),
        'Wr': s * jax.random.normal(ks[3], (2 * H + E, H), jnp.float32),
        'br': jnp.zeros((1, H), jnp.float32),
        'Wout': s * jax.random.normal(ks[4], (V_full, H), jnp.float32),
    }


if __name__ == "__main__":
    B, T, E, H, S = 2, 8, 32, 32, 16
    V_FULL, V_LVT = 256, 128

    key = jax.random.PRNGKey(0)
    k_emb, k_sb, k_h0, k_par = jax.random.split(key, 4)

    params = init_params(k_par, E, H, V_FULL)

    target_emb = jax.random.normal(k_emb, (B, T, E), jnp.float32)
    len_target = jnp.array([T, T - 3], dtype=jnp.int32)
    state_below = jax.random.normal(k_sb, (B, S, H), jnp.float32)
    hidden_prev = jax.random.normal(k_h0, (B, H), jnp.float32)
    lvt_idx = jnp.arange(V_LVT, dtype=jnp.int32)                     # LVT vocab subset

    LVT = (params['Wout'], lvt_idx)
    Inputs = (target_emb, len_target)

    log_probs, h_last = generator_flat_forward(
        LVT, state_below, Inputs, params, hidden_prev)
    jax.block_until_ready((log_probs, h_last))

    assert log_probs.shape == (B, T, V_LVT)
    assert h_last.shape == (B, H)
    assert bool(jnp.all(jnp.isfinite(log_probs)))
    assert bool(jnp.all(jnp.isfinite(h_last)))
    print("KERNEL_OK")
</pallas_src>

<mosaic_0001>
module attributes {stable_mosaic.version = 11 : i64} {
  func.func @xproj_kernel(%arg0: i32, %arg1: memref<64x128xbf16, #tpu.memory_space<vmem>>, %arg2: memref<128x384xbf16, #tpu.memory_space<vmem>>, %arg3: memref<1x384xf32, #tpu.memory_space<vmem>>, %arg4: memref<128x128xbf16, #tpu.memory_space<vmem>>, %arg5: memref<64x384xf32, #tpu.memory_space<vmem>>, %arg6: memref<64x128xf32, #tpu.memory_space<vmem>>) attributes {dimension_semantics = [#tpu.dimension_semantics<parallel>], iteration_bounds = array<i64: 1>, scalar_prefetch = 0 : i64, scratch_operands = 0 : i64, tpu.core_type = #tpu.core_type<tc>, window_params = [{transform_indices = @transform_0, window_bounds = array<i64: 64, 128>}, {pipeline_mode = #tpu.pipeline_mode<synchronous>, transform_indices = @transform_1, window_bounds = array<i64: 128, 384>}, {pipeline_mode = #tpu.pipeline_mode<synchronous>, transform_indices = @transform_2, window_bounds = array<i64: 1, 384>}, {pipeline_mode = #tpu.pipeline_mode<synchronous>, transform_indices = @transform_3, window_bounds = array<i64: 128, 128>}, {transform_indices = @transform_4, window_bounds = array<i64: 64, 384>}, {transform_indices = @transform_5, window_bounds = array<i64: 64, 128>}]} {
    %c0 = arith.constant 0 : index
    %c0_0 = arith.constant 0 : index
    %0 = vector.load %arg1[%c0, %c0_0] : memref<64x128xbf16, #tpu.memory_space<vmem>>, vector<64x128xbf16>
    %c0_1 = arith.constant 0 : index
    %c0_2 = arith.constant 0 : index
    %1 = vector.load %arg2[%c0_1, %c0_2] : memref<128x384xbf16, #tpu.memory_space<vmem>>, vector<128x384xbf16>
    %cst = arith.constant dense<0.000000e+00> : vector<64x384xf32>
    %2 = tpu.matmul %0, %1, %cst {dimension_numbers = #tpu.dot_dimension_numbers<[1], [0], [0], [1], [0, 0, 1, 1], [], []>} : vector<64x128xbf16>, vector<128x384xbf16>, vector<64x384xf32> -> vector<64x384xf32>
    %c0_3 = arith.constant 0 : index
    %c0_4 = arith.constant 0 : index
    %3 = vector.load %arg3[%c0_3, %c0_4] : memref<1x384xf32, #tpu.memory_space<vmem>>, vector<1x384xf32>
    %4 = vector.broadcast %3 : vector<1x384xf32> to vector<64x384xf32>
    %5 = arith.addf %2, %4 : vector<64x384xf32>
    %c0_5 = arith.constant 0 : index
    %c0_6 = arith.constant 0 : index
    %6 = vector.load %arg5[%c0_5, %c0_6] : memref<64x384xf32, #tpu.memory_space<vmem>>, vector<64x384xf32>
    tpu.vector_store %arg5[%c0_5, %c0_6], %5 {strides = array<i32>} : memref<64x384xf32, #tpu.memory_space<vmem>>, vector<64x384xf32>,
    %c0_7 = arith.constant 0 : index
    %c0_8 = arith.constant 0 : index
    %7 = vector.load %arg4[%c0_7, %c0_8] : memref<128x128xbf16, #tpu.memory_space<vmem>>, vector<128x128xbf16>
    %cst_9 = arith.constant dense<0.000000e+00> : vector<64x128xf32>
    %8 = tpu.matmul %0, %7, %cst_9 {dimension_numbers = #tpu.dot_dimension_numbers<[1], [0], [0], [1], [0, 0, 1, 1], [], []>} : vector<64x128xbf16>, vector<128x128xbf16>, vector<64x128xf32> -> vector<64x128xf32>
    %c0_10 = arith.constant 0 : index
    %c0_11 = arith.constant 0 : index
    %9 = vector.load %arg6[%c0_10, %c0_11] : memref<64x128xf32, #tpu.memory_space<vmem>>, vector<64x128xf32>
    tpu.vector_store %arg6[%c0_10, %c0_11], %8 {strides = array<i32>} : memref<64x128xf32, #tpu.memory_space<vmem>>, vector<64x128xf32>,
    return
  }
  func.func @transform_0(%arg0: i32) -> (i32, i32) {
    %c0_i32 = arith.constant 0 : i32
    %c0_i32_0 = arith.constant 0 : i32
    return %arg0, %c0_i32 : i32, i32
  }
  func.func @transform_1(%arg0: i32) -> (i32, i32) {
    %c0_i32 = arith.constant 0 : i32
    %c0_i32_0 = arith.constant 0 : i32
    %c0_i32_1 = arith.constant 0 : i32
    return %c0_i32, %c0_i32_0 : i32, i32
  }
  func.func @transform_2(%arg0: i32) -> (i32, i32) {
    %c0_i32 = arith.constant 0 : i32
    %c0_i32_0 = arith.constant 0 : i32
    %c0_i32_1 = arith.constant 0 : i32
    return %c0_i32, %c0_i32_0 : i32, i32
  }
  func.func @transform_3(%arg0: i32) -> (i32, i32) {
    %c0_i32 = arith.constant 0 : i32
    %c0_i32_0 = arith.constant 0 : i32
    %c0_i32_1 = arith.constant 0 : i32
    return %c0_i32, %c0_i32_0 : i32, i32
  }
  func.func @transform_4(%arg0: i32) -> (i32, i32) {
    %c0_i32 = arith.constant 0 : i32
    %c0_i32_0 = arith.constant 0 : i32
    return %arg0, %c0_i32 : i32, i32
  }
  func.func @transform_5(%arg0: i32) -> (i32, i32) {
    %c0_i32 = arith.constant 0 : i32
    %c0_i32_0 = arith.constant 0 : i32
    return %arg0, %c0_i32 : i32, i32
  }
}

</mosaic_0001>

<bundles_post_ra>
// kernel: tpu_custom_call.1
= control target key start
LH: loop header
LB: loop body
LE: loop exit
PB: predicated region body
PF: predicated region fallthrough
CT: control target
= control target key end

     0   :  { %11 = vsyncpa [#allocation3], 0  ;;  %s986_s0 = inlined_call_operand.hbm [shape: bf16[64,128], index: 0, kind: input, shape index: {}]   ;;  %s987_s1 = inlined_call_operand.hbm [shape: bf16[128,384], index: 1, kind: input, shape index: {}]   ;;  %s988_s2 = inlined_call_operand.vmem [shape: f32[1,384], index: 2, kind: input, shape index: {}]   ;;  %s989_s3 = inlined_call_operand.hbm [shape: bf16[128,128], index: 3, kind: input, shape index: {}]   ;;  %s990_s4 = inlined_call_operand.hbm [shape: f32[64,384], index: 4, kind: output, shape index: {0}]   ;;  %s991_s5 = inlined_call_operand.hbm [shape: f32[64,128], index: 5, kind: output, shape index: {1}]  }
   0x1   :  { %12 = vsyncpa [#allocation6], 0 }
   0x2   :  { %13 = vsyncpa [#allocation4], 0 }
   0x3   :  { %14 = vsyncpa [#allocation10], 0  ;;  %s895_s18 = smov [#allocation5]  }
   0x4   :  { %s32_s19 = sshll.u32 %s895_s18, 4  ;;  %s33_s19 = int_to_ptr.vmem [resolvable:$true] %s32_s19 }
   0x5   :  { %s795_s20 = scalar_lea.vmem %s33_s19, 3072  ;;  %p800_p1 = scmp.lt.s32.totalorder %s33_s19, %s33_s19 }
   0x6   :  { %p796_p0 = scmp.ne.s32.totalorder %s33_s19, %s795_s20  ;;  %p801_p2 = scmp.lt.s32.totalorder %s795_s20, %s795_s20 }
   0x8   :  { %p802_p3 = por %p801_p2, %p800_p1 }
   0xa   :  { %p803_p4 = pnand %p802_p3, %p796_p0 }
   0xc   :  { %806 = shalt.err (!%p803_p4)
}
   0xd   :  { %s896_s21 = smov 192   ;;  %s897_s22 = smov 12  }
   0xe   :  { %38 = dma.hbm_to_vmem [thread:$0]  %s987_s1, 3072, %s33_s19, [#allocation6], %s896_s21, %s896_s21, %s897_s22  }
   0xf   :  { %s898_s25 = smov [#allocation2]  }
  0x10   :  { %s20_s26 = sshll.u32 %s898_s25, 4  ;;  %s21_s26 = int_to_ptr.vmem [resolvable:$true] %s20_s26 }
  0x11   :  { %s815_s27 = scalar_lea.vmem %s21_s26, 512  ;;  %p820_p6 = scmp.lt.s32.totalorder %s21_s26, %s21_s26 }
  0x12   :  { %p816_p5 = scmp.ne.s32.totalorder %s21_s26, %s815_s27  ;;  %p821_p7 = scmp.lt.s32.totalorder %s815_s27, %s815_s27 }
  0x14   :  { %p822_p8 = por %p821_p7, %p820_p6 }
  0x16   :  { %p823_p9 = pnand %p822_p8, %p816_p5 }
  0x18   :  { %826 = shalt.err (!%p823_p9)
}
  0x19   :  { %s899_s28 = smov 64   ;;  %s900_s29 = smov 4  }
  0x1a   :  { %26 = dma.hbm_to_vmem [thread:$0]  %s986_s0, 512, %s21_s26, [#allocation3], %s899_s28, %s899_s28, %s900_s29  }
  0x1b   :  { %s901_s7 = smov [#allocation7]  }
  0x1c   :  { %s46_s8 = sshll.u32 %s901_s7, 4  ;;  %s47_s8 = int_to_ptr.vmem [resolvable:$true] %s46_s8 }
  0x1d   :  { %s835_s1 = scalar_lea.vmem %s47_s8, 1024  ;;  %p840_p11 = scmp.lt.s32.totalorder %s47_s8, %s47_s8 }
  0x1e   :  { %p836_p10 = scmp.ne.s32.totalorder %s47_s8, %s835_s1  ;;  %p841_p12 = scmp.lt.s32.totalorder %s835_s1, %s835_s1 }
  0x20   :  { %p842_p13 = por %p841_p12, %p840_p11 }
  0x22   :  { %p843_p0 = pnand %p842_p13, %p836_p10 }
  0x24   :  { %846 = shalt.err (!%p843_p0)
}
  0x25   :  { %52 = dma.hbm_to_vmem [thread:$0]  %s989_s3, 1024, %s47_s8, [#allocation6], %s899_s28, %s899_s28, %s900_s29  }
  0x26   :  { %887 = dma.done.wait [#allocation3], 512  }
  0x27   :  { %888 = vsyncadd [#allocation3], 4294966784 }
  0x28   :  { %889 = dma.done.wait [#allocation6], 4096  }
  0x29   :  { %890 = vsyncadd [#allocation6], 4294963200  ;;  %v902_v0 = vmov 0   ;;  %v743_v1 = vld [vmem:[#allocation5 + $0xac] ss:$12 sps:$4 sm:$0xff]   ;;  %v949_v19 = vld [vmem:[#allocation2] sm:$0xff]   ;;  %v105_v37 = vlaneseq }
  0x2a   :  { %304 = vmatprep.mubr.bf16.mxu0 %v902_v0  ;;  %v745_v2 = vld [vmem:[#allocation5 + $0xb0] ss:$12 sps:$4 sm:$0xff]   ;;  %272 = vmatprep.subr.bf16.mxu0 %v743_v1  ;;  %v746_v3 = vld [vmem:[#allocation5 + $0xa8] ss:$12 sps:$4 sm:$0xff]   ;;  %v749_v5 = vld [vmem:[#allocation5 + $0x98] ss:$12 sps:$4 sm:$0xff]  }
  0x2b   :  { %665 = vmatprep.subr.bf16.mxu1 %v745_v2  ;;  %v747_v4 = vld [vmem:[#allocation5 + $0x94] ss:$12 sps:$4 sm:$0xff]   ;;  %273 = vmatpush1.bf16.msra.mxu0 %v746_v3  ;;  %v750_v6 = vld [vmem:[#allocation5 + $0x90] ss:$12 sps:$4 sm:$0xff]   ;;  %v754_v9 = vld [vmem:[#allocation5 + $0x78] ss:$12 sps:$4 sm:$0xff]  }
  0x2c   :  { %666 = vmatpush3.bf16.msra.mxu1 %v745_v2  ;;  %274 = vmatprep.subr.bf16.mxu0 %v747_v4  ;;  %v751_v7 = vld [vmem:[#allocation5 + $0x7c] ss:$12 sps:$4 sm:$0xff]   ;;  %v753_v8 = vld [vmem:[#allocation5 + $0x80] ss:$12 sps:$4 sm:$0xff]   ;;  %v755_v10 = vld [vmem:[#allocation5 + $0x64] ss:$12 sps:$4 sm:$0xff]  }
  0x2d   :  { %667 = vmatprep.subr.bf16.mxu1 %v749_v5  ;;  %v757_v11 = vld [vmem:[#allocation5 + $0x68] ss:$12 sps:$4 sm:$0xff]   ;;  %v758_v12 = vld [vmem:[#allocation5 + $0x60] ss:$12 sps:$4 sm:$0xff]   ;;  %v761_v14 = vld [vmem:[#allocation5 + $0x50] ss:$12 sps:$4 sm:$0xff]   ;;  %681 = vmatprep.mubr.bf16.mxu1 %v949_v19 }
  0x2e   :  { %v759_v13 = vld [vmem:[#allocation5 + $0x4c] ss:$12 sps:$4 sm:$0xff]   ;;  %v762_v15 = vld [vmem:[#allocation5 + $0x48] ss:$12 sps:$4 sm:$0xff]   ;;  %v766_v18 = vld [vmem:[#allocation5 + $0x30] ss:$12 sps:$4 sm:$0xff]  }
  0x2f   :  { %275 = vmatpush1.bf16.msra.mxu0 %v750_v6  ;;  %v763_v16 = vld [vmem:[#allocation5 + $0x34] ss:$12 sps:$4 sm:$0xff]   ;;  %v765_v17 = vld [vmem:[#allocation5 + $0x38] ss:$12 sps:$4 sm:$0xff]   ;;  %v767_v20 = vld [vmem:[#allocation5 + $0x1c] ss:$12 sps:$4 sm:$0xff]  }
  0x30   :  { %668 = vmatpush3.bf16.msra.mxu1 %v749_v5  ;;  %276 = vmatprep.subr.bf16.mxu0 %v751_v7  ;;  %v769_v21 = vld [vmem:[#allocation5 + $0x20] ss:$12 sps:$4 sm:$0xff]   ;;  %v770_v22 = vld [vmem:[#allocation5 + $0x18] ss:$12 sps:$4 sm:$0xff]   ;;  %v773_v24 = vld [vmem:[#allocation5 + $0x8] ss:$12 sps:$4 sm:$0xff]  }
  0x31   :  { %669 = vmatprep.subr.bf16.mxu1 %v753_v8  ;;  %v771_v23 = vld [vmem:[#allocation5 + $0x4] ss:$12 sps:$4 sm:$0xff]   ;;  %v774_v25 = vld [vmem:[#allocation5] ss:$12 sps:$4 sm:$0xff]   ;;  %v777_v26 = vld [vmem:[#allocation7 + $0x38] sm:$0xff]   ;;  %v106_v38 = vshrl.u32 %v105_v37, 7 }
  0x32   :  { %v776_v27 = vld [vmem:[#allocation2 + $0x8] sm:$0xff]   ;;  %v778_v28 = vld [vmem:[#allocation7 + $0x30] sm:$0xff]   ;;  %v783_v31 = vld [vmem:[#allocation2 + $0x18] sm:$0xff]   ;;  %s904_s12 = smov [#allocation9]  }
  0x33   :  { %277 = vmatpush1.bf16.msra.mxu0 %v754_v9  ;;  %v781_v29 = vld [vmem:[#allocation2 + $0x10] sm:$0xff]   ;;  %v779_v30 = vld [vmem:[#allocation7 + $0x28] sm:$0xff]   ;;  %v780_v32 = vld [vmem:[#allocation7 + $0x20] sm:$0xff]   ;;  %v107_v39 = vsub.s32 0, %v106_v38  ;;  %v115_v40 = vsub.s32 2, %v106_v38  ;;  %v111_v42 = vsub.s32 1, %v106_v38 }
  0x34   :  { %670 = vmatpush3.bf16.msra.mxu1 %v753_v8  ;;  %278 = vmatprep.subr.bf16.mxu0 %v755_v10  ;;  %v782_v33 = vld [vmem:[#allocation7 + $0x18] sm:$0xff]   ;;  %v784_v34 = vld [vmem:[#allocation7 + $0x10] sm:$0xff]   ;;  %v785_v35 = vld [vmem:[#allocation7 + $0x8] sm:$0xff]   ;;  %s588_s13 = sshll.u32 %s904_s12, 4  ;;  %s589_s13 = int_to_ptr.vmem [resolvable:$true] %s588_s13 }
  0x35   :  { %671 = vmatprep.subr.bf16.mxu1 %v757_v11  ;;  %v786_v36 = vld [vmem:[#allocation7] sm:$0xff]  }
  0x36   :  { %v103_v41 = vld [vmem:[%s988_s2] sm:$0x7]  ;;  %s903_s2 = smov [#allocation8]  }
  0x37   :  { %279 = vmatpush1.bf16.msra.mxu0 %v758_v12  ;;  %v960_v43 = vrot.slane %v103_v41, %v107_v39  ;;  %v116_v44 = vrot.slane %v103_v41, %v115_v40  ;;  %v962_v45 = vrot.slane %v103_v41, %v111_v42  ;;  %s576_s11 = sshll.u32 %s903_s2, 4  ;;  %s577_s11 = int_to_ptr.vmem [resolvable:$true] %s576_s11 }
  0x38   :  { %672 = vmatpush3.bf16.msra.mxu1 %v757_v11  ;;  %280 = vmatprep.subr.bf16.mxu0 %v759_v13  ;;  %s847_s14 = scalar_lea.vmem %s577_s11, 3072  ;;  %p852_p2 = scmp.lt.s32.totalorder %s577_s11, %s577_s11 }
  0x39   :  { %673 = vmatprep.subr.bf16.mxu1 %v761_v14  ;;  %p848_p1 = scmp.ne.s32.totalorder %s577_s11, %s847_s14  ;;  %p853_p3 = scmp.lt.s32.totalorder %s847_s14, %s847_s14 }
  0x3b   :  { %281 = vmatpush1.bf16.msra.mxu0 %v762_v15  ;;  %p854_p4 = por %p853_p3, %p852_p2 }
  0x3c   :  { %674 = vmatpush3.bf16.msra.mxu1 %v761_v14  ;;  %282 = vmatprep.subr.bf16.mxu0 %v763_v16 }
  0x3d   :  { %675 = vmatprep.subr.bf16.mxu1 %v765_v17  ;;  %p855_p5 = pnand %p854_p4, %p848_p1 }
  0x3f   :  { %283 = vmatpush1.bf16.msra.mxu0 %v766_v18 }
  0x40   :  { %676 = vmatpush3.bf16.msra.mxu1 %v765_v17  ;;  %284 = vmatprep.subr.bf16.mxu0 %v767_v20 }
  0x41   :  { %677 = vmatprep.subr.bf16.mxu1 %v769_v21 }
  0x43   :  { %285 = vmatpush1.bf16.msra.mxu0 %v770_v22 }
  0x44   :  { %678 = vmatpush3.bf16.msra.mxu1 %v769_v21  ;;  %286 = vmatprep.subr.bf16.mxu0 %v771_v23 }
  0x45   :  { %679 = vmatprep.subr.bf16.mxu1 %v773_v24 }
  0x47   :  { %287 = vmatpush1.bf16.msra.mxu0 %v774_v25 }
  0x48   :  { %680 = vmatpush3.bf16.msra.mxu1 %v773_v24  ;;  %689 = vmatprep.subr.bf16.mxu0 %v777_v26 }
  0x49   :  { %713 = vmatprep.subr.bf16.mxu1 %v777_v26 }
  0x4a   :  { %305 = vmatmul.mubr.bf16.vlgmr.msra.gmra.mxu0 %v949_v19 }
  0x4b   :  { %682 = vmatmul.mubr.bf16.vlgmr.msra.gmra.mxu1 %v776_v27  ;;  %690 = vmatpush3.bf16.msra.mxu0 %v777_v26 }
  0x4c   :  { %721 = vmatpush3.bf16.msra.mxu1 %v777_v26  ;;  %691 = vmatprep.subr.bf16.mxu0 %v778_v28 }
  0x4d   :  { %714 = vmatprep.subr.bf16.mxu1 %v778_v28  ;;  %314 = vmatprep.mubr.bf16.mxu0 %v902_v0 }
  0x4e   :  { %685 = vmatprep.mubr.bf16.mxu1 %v781_v29 }
  0x4f   :  { %692 = vmatpush3.bf16.msra.mxu0 %v778_v28 }
  0x50   :  { %722 = vmatpush3.bf16.msra.mxu1 %v778_v28  ;;  %693 = vmatprep.subr.bf16.mxu0 %v779_v30 }
  0x51   :  { %715 = vmatprep.subr.bf16.mxu1 %v779_v30 }
  0x52   :  { %315 = vmatmul.mubr.bf16.gmra.mxu0 %v776_v27 }
  0x53   :  { %686 = vmatmul.mubr.bf16.gmra.mxu1 %v783_v31  ;;  %694 = vmatpush3.bf16.msra.mxu0 %v779_v30 }
  0x54   :  { %723 = vmatpush3.bf16.msra.mxu1 %v779_v30  ;;  %695 = vmatprep.subr.bf16.mxu0 %v780_v32 }
  0x55   :  { %716 = vmatprep.subr.bf16.mxu1 %v780_v32  ;;  %324 = vmatprep.mubr.bf16.mxu0 %v902_v0 }
  0x56   :  { %709 = vmatprep.mubr.bf16.mxu1 %v781_v29 }
  0x57   :  { %696 = vmatpush3.bf16.msra.mxu0 %v780_v32 }
  0x58   :  { %724 = vmatpush3.bf16.msra.mxu1 %v780_v32  ;;  %697 = vmatprep.subr.bf16.mxu0 %v782_v33 }
  0x59   :  { %717 = vmatprep.subr.bf16.mxu1 %v782_v33 }
  0x5a   :  { %325 = vmatmul.mubr.bf16.gmra.mxu0 %v781_v29 }
  0x5b   :  { %698 = vmatpush3.bf16.msra.mxu0 %v782_v33  ;;  %334 = vmatprep.mubr.bf16.mxu0 %v902_v0 }
  0x5c   :  { %725 = vmatpush3.bf16.msra.mxu1 %v782_v33  ;;  %699 = vmatprep.subr.bf16.mxu0 %v784_v34 }
  0x5d   :  { %718 = vmatprep.subr.bf16.mxu1 %v784_v34 }
  0x5f   :  { %700 = vmatpush3.bf16.msra.mxu0 %v784_v34 }
  0x60   :  { %726 = vmatpush3.bf16.msra.mxu1 %v784_v34  ;;  %701 = vmatprep.subr.bf16.mxu0 %v785_v35 }
  0x61   :  { %719 = vmatprep.subr.bf16.mxu1 %v785_v35 }
  0x62   :  { %335 = vmatmul.mubr.bf16.gmra.mxu0 %v783_v31 }
  0x63   :  { %702 = vmatpush3.bf16.msra.mxu0 %v785_v35  ;;  %705 = vmatprep.mubr.bf16.mxu0 %v949_v19 }
  0x64   :  { %727 = vmatpush3.bf16.msra.mxu1 %v785_v35  ;;  %703 = vmatprep.subr.bf16.mxu0 %v786_v36 }
  0x65   :  { %720 = vmatprep.subr.bf16.mxu1 %v786_v36 }
  0x67   :  { %704 = vmatpush3.bf16.msra.mxu0 %v786_v36 }
  0x68   :  { %728 = vmatpush3.bf16.msra.mxu1 %v786_v36 }
  0x6a   :  { %706 = vmatmul.mubr.bf16.vlgmr.msra.gmra.mxu0 %v776_v27 }
  0x6b   :  { %710 = vmatmul.mubr.bf16.vlgmr.msra.gmra.mxu1 %v783_v31 }
 0x10a   :  { %v306_v46 = vpop.f32.mrf.mxu0 }
 0x10b   :  { %v683_v47 = vpop.f32.mrf.mxu1  ;;  %v307_v48 = vadd.f32 %v306_v46, %v960_v43 }
 0x10c   :  { %v388_v49 = vadd.f32 %v683_v47, %v116_v44  ;;  %v308_v50 = vpop.f32.mrf.mxu0 }
 0x10d   :  { %v379_v51 = vpop.f32.mrf.mxu1  ;;  %410 = vst [vmem:[#allocation8] sm:$0xff] %v307_v48  ;;  %v309_v52 = vadd.f32 %v308_v50, %v962_v45 }
 0x10e   :  { %418 = vst [vmem:[#allocation8 + $0x40] sm:$0xff] %v388_v49  ;;  %v380_v53 = vadd.f32 %v379_v51, %v116_v44  ;;  %v310_v54 = vpop.f32.mrf.mxu0 }
 0x10f   :  { %v684_v55 = vpop.f32.mrf.mxu1  ;;  %411 = vst [vmem:[#allocation8 + $0x8] sm:$0xff] %v309_v52  ;;  %v311_v56 = vadd.f32 %v310_v54, %v960_v43 }
 0x110   :  { %412 = vst [vmem:[#allocation8 + $0x10] sm:$0xff] %v380_v53  ;;  %v391_v57 = vadd.f32 %v684_v55, %v116_v44  ;;  %v312_v58 = vpop.f32.mrf.mxu0 }
 0x111   :  { %v382_v59 = vpop.f32.mrf.mxu1  ;;  %413 = vst [vmem:[#allocation8 + $0x18] sm:$0xff] %v311_v56  ;;  %v313_v60 = vadd.f32 %v312_v58, %v962_v45 }
 0x112   :  { %421 = vst [vmem:[#allocation8 + $0x58] sm:$0xff] %v391_v57  ;;  %v383_v61 = vadd.f32 %v382_v59, %v116_v44  ;;  %v316_v62 = vpop.f32.mrf.mxu0 }
 0x113   :  { %v687_v63 = vpop.f32.mrf.mxu1  ;;  %414 = vst [vmem:[#allocation8 + $0x20] sm:$0xff] %v313_v60  ;;  %v317_v0 = vadd.f32 %v316_v62, %v960_v43 }
 0x114   :  { %415 = vst [vmem:[#allocation8 + $0x28] sm:$0xff] %v383_v61  ;;  %v404_v1 = vadd.f32 %v687_v63, %v116_v44  ;;  %v318_v2 = vpop.f32.mrf.mxu0 }
 0x115   :  { %v395_v3 = vpop.f32.mrf.mxu1  ;;  %416 = vst [vmem:[#allocation8 + $0x30] sm:$0xff] %v317_v0  ;;  %v319_v4 = vadd.f32 %v318_v2, %v962_v45 }
 0x116   :  { %430 = vst [vmem:[#allocation8 + $0xa0] sm:$0xff] %v404_v1  ;;  %v396_v5 = vadd.f32 %v395_v3, %v116_v44  ;;  %v320_v6 = vpop.f32.mrf.mxu0 }
 0x117   :  { %v688_v7 = vpop.f32.mrf.mxu1  ;;  %417 = vst [vmem:[#allocation8 + $0x38] sm:$0xff] %v319_v4  ;;  %v321_v8 = vadd.f32 %v320_v6, %v960_v43 }
 0x118   :  { %424 = vst [vmem:[#allocation8 + $0x70] sm:$0xff] %v396_v5  ;;  %v407_v9 = vadd.f32 %v688_v7, %v116_v44  ;;  %v322_v10 = vpop.f32.mrf.mxu0 }
 0x119   :  { %v398_v11 = vpop.f32.mrf.mxu1  ;;  %419 = vst [vmem:[#allocation8 + $0x48] sm:$0xff] %v321_v8  ;;  %v323_v12 = vadd.f32 %v322_v10, %v962_v45 }
 0x11a   :  { %433 = vst [vmem:[#allocation8 + $0xb8] sm:$0xff] %v407_v9  ;;  %v399_v13 = vadd.f32 %v398_v11, %v116_v44  ;;  %v326_v14 = vpop.f32.mrf.mxu0 }
 0x11b   :  { %420 = vst [vmem:[#allocation8 + $0x50] sm:$0xff] %v323_v12  ;;  %v327_v15 = vadd.f32 %v326_v14, %v960_v43 }
 0x11c   :  { %427 = vst [vmem:[#allocation8 + $0x88] sm:$0xff] %v399_v13  ;;  %v328_v16 = vpop.f32.mrf.mxu0 }
 0x11d   :  { %422 = vst [vmem:[#allocation8 + $0x60] sm:$0xff] %v327_v15  ;;  %v329_v17 = vadd.f32 %v328_v16, %v962_v45 }
 0x11e   :  { %v330_v18 = vpop.f32.mrf.mxu0 }
 0x11f   :  { %423 = vst [vmem:[#allocation8 + $0x68] sm:$0xff] %v329_v17  ;;  %v331_v19 = vadd.f32 %v330_v18, %v960_v43 }
 0x120   :  { %v332_v20 = vpop.f32.mrf.mxu0 }
 0x121   :  { %425 = vst [vmem:[#allocation8 + $0x78] sm:$0xff] %v331_v19  ;;  %v333_v21 = vadd.f32 %v332_v20, %v962_v45 }
 0x122   :  { %v336_v22 = vpop.f32.mrf.mxu0 }
 0x123   :  { %426 = vst [vmem:[#allocation8 + $0x80] sm:$0xff] %v333_v21  ;;  %v337_v23 = vadd.f32 %v336_v22, %v960_v43 }
 0x124   :  { %v338_v24 = vpop.f32.mrf.mxu0 }
 0x125   :  { %428 = vst [vmem:[#allocation8 + $0x90] sm:$0xff] %v337_v23  ;;  %v339_v25 = vadd.f32 %v338_v24, %v962_v45 }
 0x126   :  { %v340_v26 = vpop.f32.mrf.mxu0 }
 0x127   :  { %429 = vst [vmem:[#allocation8 + $0x98] sm:$0xff] %v339_v25  ;;  %v341_v27 = vadd.f32 %v340_v26, %v960_v43 }
 0x128   :  { %v342_v28 = vpop.f32.mrf.mxu0 }
 0x129   :  { %431 = vst [vmem:[#allocation8 + $0xa8] sm:$0xff] %v341_v27  ;;  %v343_v29 = vadd.f32 %v342_v28, %v962_v45 }
 0x12a   :  { %v707_v30 = vpop.f32.mrf.mxu0 }
 0x12b   :  { %v711_v31 = vpop.f32.mrf.mxu1  ;;  %432 = vst [vmem:[#allocation8 + $0xb0] sm:$0xff] %v343_v29  ;;  %565 = vst [vmem:[#allocation9 + $0x10] sm:$0xff] %v707_v30 }
 0x12c   :  { %569 = vst [vmem:[#allocation9 + $0x30] sm:$0xff] %v711_v31  ;;  %v532_v32 = vpop.f32.mrf.mxu0 }
 0x12d   :  { %v548_v33 = vpop.f32.mrf.mxu1 }
 0x12e   :  { %858 = shalt.err (!%p855_p5)
}
 0x12f   :  { %s905_s15 = smov 384   ;;  %s906_s16 = smov 24   ;;  %563 = vst [vmem:[#allocation9] sm:$0xff] %v532_v32  ;;  %567 = vst [vmem:[#allocation9 + $0x20] sm:$0xff] %v548_v33  ;;  %v708_v34 = vpop.f32.mrf.mxu0  ;;  %v712_v35 = vpop.f32.mrf.mxu1 }
 0x130   :  { %582 = dma.vmem_to_hbm [thread:$0]  %s577_s11, 3072, %s990_s4, [#allocation4], %s905_s15, %s905_s15, %s906_s16   ;;  %566 = vst [vmem:[#allocation9 + $0x18] sm:$0xff] %v708_v34  ;;  %570 = vst [vmem:[#allocation9 + $0x38] sm:$0xff] %v712_v35 }
 0x131   :  { %v535_v36 = vpop.f32.mrf.mxu0  ;;  %v551_v37 = vpop.f32.mrf.mxu1  ;;  %s867_s19 = scalar_lea.vmem %s589_s13, 1024  ;;  %p872_p7 = scmp.lt.s32.totalorder %s589_s13, %s589_s13 }
 0x132   :  { %564 = vst [vmem:[#allocation9 + $0x8] sm:$0xff] %v535_v36  ;;  %568 = vst [vmem:[#allocation9 + $0x28] sm:$0xff] %v551_v37  ;;  %p868_p6 = scmp.ne.s32.totalorder %s589_s13, %s867_s19  ;;  %p873_p8 = scmp.lt.s32.totalorder %s867_s19, %s867_s19 }
 0x134   :  { %p874_p9 = por %p873_p8, %p872_p7 }
 0x136   :  { %p875_p10 = pnand %p874_p9, %p868_p6 }
 0x138   :  { %878 = shalt.err (!%p875_p10)
}
 0x139   :  { %s907_s20 = smov 128   ;;  %s908_s4 = smov 8  }
 0x13a   :  { %594 = dma.vmem_to_hbm [thread:$0]  %s589_s13, 1024, %s991_s5, [#allocation10], %s907_s20, %s907_s20, %s908_s4  }
 0x13b   :  { %891 = dma.done.wait [#allocation4], 3072  }
 0x13c   :  { %892 = vsyncadd [#allocation4], 4294964224 }
 0x13d   :  { %893 = dma.done.wait [#allocation10], 1024  }
 0x13e   :  { %894 = vsyncadd [#allocation10], 4294966272 }
 0x13f   :  { %601 = vsyncpa [#allocation3], 1 }
 0x140   :  { %602 = vsyncpa [#allocation6], 1 }
 0x141   :  { %603 = vsyncpa [#allocation4], 1 }
 0x142   :  { %604 = vsyncpa [#allocation10], 1 }

</bundles_post_ra>
